<compile_context>
chip_gen: v7x
topology: tpu7x:2x2x1
jax: 0.10.0
libtpu: 0.0.40
codegen_flags: <defaults>
</compile_context>

<pallas_src>
import jax
import jax.numpy as jnp
from jax.experimental import pallas as pl
from jax.experimental.pallas import tpu as pltpu

GIN_EPS = 0.0    # GINConv default epsilon
NORM_EPS = 1e-4  # eps from KaryGNN.forward


def _round_up(x, m):
    return ((x + m - 1) // m) * m


def _kary_rpgnn_kernel(adj_ref, z_ref, b1_ref, wts_ref, w2_ref, bias_ref,
                       o_ref, pooled_acc):
    """Row-tiled fused forward over all permutations.

    Grid: (N // TM,) — the row-tile axis doubles as the graph-pooling reduction.

    adj_ref    : [TM, N]        bf16  adjacency row stripe with (1+eps)*I folded in
    z_ref      : [N, P*hid]     bf16  lane-packed X_p @ W1 (resident across the grid)
    b1_ref     : [1, P*hid]     f32   b1 tiled per permutation
    wts_ref    : [G_pad, TM]    bf16  column tile of (norm @ pool) / P
    w2_ref     : [P*hid, O_pad] bf16  W2 row-stacked per permutation (sums the perms)
    bias_ref   : [G_pad, O_pad] f32   precomputed output-bias contribution
    o_ref      : [G_pad, O_pad] f32   lane-dense output slab (written on last tile)
    pooled_acc : [G_pad, P*hid] f32   VMEM accumulator for the pooled representation
    """
    i = pl.program_id(0)

    @pl.when(i == 0)
    def _init():
        pooled_acc[...] = jnp.zeros_like(pooled_acc)

    # Stage 1 (MXU, bf16 operands / f32 accumulate): GIN aggregation for every permutation
    # at once.  Self term is pre-folded into adj_ref and W1 is pre-applied via associativity,
    # so there is no block-diagonal kron(I_P, W1) and no VPU filler after the matmul.
    agg = jnp.dot(adj_ref[...], z_ref[...], preferred_element_type=jnp.float32)
    h = jnp.maximum(agg + b1_ref[...], 0.0)          # f32 VPU (keep f32 for v5e)

    # Stage 2 (MXU): graphlet pooling + normalized graphlet counts + 1/P mean, all folded
    # into wts_ref; accumulated over row tiles so h never materializes beyond one tile.
    pooled_acc[...] += jnp.dot(wts_ref[...], h.astype(jnp.bfloat16),
                               preferred_element_type=jnp.float32)

    # Stage 3 (last tile only): second MLP layer, summed over permutations by the row-stacked
    # W2, plus the precomputed bias.  Single unmasked full-vreg store of the [8,128] slab.
    @pl.when(i == pl.num_programs(0) - 1)
    def _finalize():
        o_ref[...] = (jnp.dot(pooled_acc[...].astype(jnp.bfloat16), w2_ref[...],
                              preferred_element_type=jnp.float32) + bias_ref[...])


def kary_rpgnn_forward(x_all, adj, pool, w1, b1, w2, b2, ghg, *, row_tile=128):
    num_perm, n, _f_in = x_all.shape
    g = ghg.shape[0]
    hid = w1.shape[1]
    out_dim = w2.shape[1]
    ph = num_perm * hid

    g_pad = _round_up(g, 8)            # sublane-dense output rows
    out_pad = _round_up(out_dim, 128)  # lane-dense output columns -> unmasked vst

    # Row-tile size: a multiple of 128 (lane constraint on the pooling-weights tile) that
    # divides N, else a single stripe.  Bump row_tile on v6e/v5e (128 MiB VMEM) to cut grid
    # steps; on v7x keep 2*(TM*N*2B) + N*P*hid*2B + weights + W2 well under 64 MiB and set
    # vmem_limit_bytes to match.  For very large N also tile the contraction (K) axis.
    if row_tile % 128 == 0 and n % row_tile == 0 and n > row_tile:
        tm = row_tile
    else:
        tm = n

    # ---- hoisted precompute (permutation-invariant or per-permutation, MXU-cheap) --------
    # Fold the GIN self term into the adjacency (exact: small-int adjacency, eps = 0).
    adj_aug = (adj + (1.0 + GIN_EPS) * jnp.eye(n, dtype=adj.dtype)).astype(jnp.bfloat16)

    # weights[g, n] = normalized graphlet count folded with graphlet pooling and 1/P mean.
    norm = ghg / (jnp.sum(ghg, axis=-1, keepdims=True) + NORM_EPS)              # [G, NG]
    weights = (norm @ pool) / float(num_perm)                                    # [G, N]
    # Output bias contribution:  sum_p weights @ (1_N b2) = P * rowsum(weights) * b2.
    bias_out = float(num_perm) * jnp.sum(weights, axis=-1, keepdims=True) * b2   # [G, O]

    weights_pad = (jnp.zeros((g_pad, n), jnp.float32).at[:g, :].set(weights)
                   .astype(jnp.bfloat16))
    bias_pad = jnp.zeros((g_pad, out_pad), jnp.float32).at[:g, :out_dim].set(bias_out)

    # Apply the *real* [F_in, hid] W1 per permutation (associativity:
    # adj_aug @ (X @ W1) == (adj_aug @ X) @ W1) and lane-pack the result.
    z_all = jnp.einsum('pnf,fh->pnh', x_all, w1)                                 # f32
    z_lanes = jnp.transpose(z_all, (1, 0, 2)).reshape(n, ph).astype(jnp.bfloat16)
    b1_rep = jnp.tile(b1, (1, num_perm)).astype(jnp.float32)                     # [1, P*hid]

    # Row-stacked W2 sums the per-permutation contributions inside one matmul; pad lanes.
    w2_stk = jnp.tile(w2, (num_perm, 1))                                         # [P*hid, O]
    w2_stk_pad = (jnp.zeros((ph, out_pad), jnp.float32).at[:, :out_dim].set(w2_stk)
                  .astype(jnp.bfloat16))

    out_full = pl.pallas_call(
        _kary_rpgnn_kernel,
        out_shape=jax.ShapeDtypeStruct((g_pad, out_pad), jnp.float32),
        grid_spec=pltpu.PrefetchScalarGridSpec(
            num_scalar_prefetch=0,
            grid=(n // tm,),
            in_specs=[
                pl.BlockSpec((tm, n), lambda i: (i, 0)),             # adj_aug row stripe
                pl.BlockSpec((n, ph), lambda i: (0, 0)),             # Z, resident
                pl.BlockSpec((1, ph), lambda i: (0, 0)),             # b1 tile
                pl.BlockSpec((g_pad, tm), lambda i: (0, i)),         # pooling-weight cols
                pl.BlockSpec((ph, out_pad), lambda i: (0, 0)),       # stacked W2
                pl.BlockSpec((g_pad, out_pad), lambda i: (0, 0)),    # bias
            ],
            out_specs=pl.BlockSpec((g_pad, out_pad), lambda i: (0, 0)),
            scratch_shapes=[pltpu.VMEM((g_pad, ph), jnp.float32)],
        ),
        compiler_params=pltpu.CompilerParams(
            # The row-tile axis carries the pooled accumulation -> reduction ("arbitrary").
            dimension_semantics=("arbitrary",),
        ),
    )(adj_aug, z_lanes, b1_rep, weights_pad, w2_stk_pad, bias_pad)

    return out_full[:g, :out_dim]


def reference_forward(x_all, adj, pool, w1, b1, w2, b2, ghg):
    """Pure-JAX fp32 reference (mirrors the PyTorch semantics)."""
    num_perm = x_all.shape[0]
    out = None
    for p in range(num_perm):
        x = x_all[p]
        agg = adj @ x + (1.0 + GIN_EPS) * x
        h = jnp.maximum(agg @ w1 + b1, 0.0)
        nodes = h @ w2 + b2
        g_repr = pool @ nodes                                 # == reshape(-1, gsz, O).sum(1)
        norm = ghg / (ghg.sum(-1, keepdims=True) + NORM_EPS)
        contrib = norm @ g_repr / num_perm
        out = contrib if out is None else out + contrib
    return out


if __name__ == "__main__":
    graphlet_sz = 4
    num_graphlets = 64
    num_nodes = num_graphlets * graphlet_sz        # 256 -> two 128-row tiles
    feat_dim = 8
    f_in = feat_dim + graphlet_sz                  # 12 (features ++ permuted one-hot node ids)
    hidden = 32
    out_dim = 32
    num_graphs = 2
    num_perm = 2

    key = jax.random.PRNGKey(0)
    k_perm, k_x, k_ghg, k_w1, k_b1, k_w2, k_b2 = jax.random.split(key, 7)

    # Base node features.
    x = jax.random.normal(k_x, (num_nodes, feat_dim), dtype=jnp.float32)

    # Deterministic "random" permutations of the graphlet-size identity (one per graphlet
    # per permutation): argsort of uniform scores == torch.randperm equivalent.
    scores = jax.random.uniform(k_perm, (num_perm, num_graphlets, graphlet_sz))
    perm_idx = jnp.argsort(scores, axis=-1)                                  # [P, NG, gsz]
    node_id_feats = jax.nn.one_hot(perm_idx, graphlet_sz, dtype=jnp.float32)
    node_id_feats = node_id_feats.reshape(num_perm, num_nodes, graphlet_sz)  # [P, N, gsz]
    x_all = jnp.concatenate(
        [jnp.broadcast_to(x, (num_perm, num_nodes, feat_dim)), node_id_feats], axis=-1)

    # edge_index: a bidirectional ring inside every graphlet -> dense adjacency.
    base = jnp.arange(num_nodes)
    nxt = (base // graphlet_sz) * graphlet_sz + (base + 1) % graphlet_sz
    src = jnp.concatenate([base, nxt])
    dst = jnp.concatenate([nxt, base])
    adj = jnp.zeros((num_nodes, num_nodes), jnp.float32).at[dst, src].add(1.0)

    # Graphlet pooling matrix: pool[g, n] = 1 iff node n belongs to graphlet g.
    pool = (jnp.arange(num_nodes) // graphlet_sz
            == jnp.arange(num_graphlets)[:, None]).astype(jnp.float32)

    # graph_has_graphlet counts.
    ghg = jax.random.randint(k_ghg, (num_graphs, num_graphlets), 0, 5).astype(jnp.float32)

    # GIN MLP parameters (deterministic init).
    w1 = jax.random.normal(k_w1, (f_in, hidden), jnp.float32) * 0.1
    b1 = jax.random.normal(k_b1, (1, hidden), jnp.float32) * 0.01
    w2 = jax.random.normal(k_w2, (hidden, out_dim), jnp.float32) * 0.1
    b2 = jax.random.normal(k_b2, (1, out_dim), jnp.float32) * 0.01

    out = kary_rpgnn_forward(x_all, adj, pool, w1, b1, w2, b2, ghg)
    out = jax.block_until_ready(out)

    ref = reference_forward(x_all, adj, pool, w1, b1, w2, b2, ghg)
    assert out.shape == (num_graphs, out_dim)
    # bf16 MXU operands vs fp32 reference -> loosened tolerance (per perf review).
    assert jnp.allclose(out, ref, atol=5e-2, rtol=5e-2), "mismatch vs JAX reference"

    print("KERNEL_OK")
</pallas_src>

<mosaic_0001>
module attributes {stable_mosaic.version = 11 : i64} {
  func.func @_kary_rpgnn_kernel(%arg0: i32, %arg1: memref<128x256xbf16, #tpu.memory_space<vmem>>, %arg2: memref<256x64xbf16, #tpu.memory_space<vmem>>, %arg3: memref<1x64xf32, #tpu.memory_space<vmem>>, %arg4: memref<8x128xbf16, #tpu.memory_space<vmem>>, %arg5: memref<64x128xbf16, #tpu.memory_space<vmem>>, %arg6: memref<8x128xf32, #tpu.memory_space<vmem>>, %arg7: memref<8x128xf32, #tpu.memory_space<vmem>>, %arg8: memref<8x64xf32, #tpu.memory_space<vmem>>) attributes {dimension_semantics = [#tpu.dimension_semantics<arbitrary>], iteration_bounds = array<i64: 2>, scalar_prefetch = 0 : i64, scratch_operands = 1 : i64, tpu.core_type = #tpu.core_type<tc>, window_params = [{transform_indices = @transform_0, window_bounds = array<i64: 128, 256>}, {pipeline_mode = #tpu.pipeline_mode<synchronous>, transform_indices = @transform_1, window_bounds = array<i64: 256, 64>}, {pipeline_mode = #tpu.pipeline_mode<synchronous>, transform_indices = @transform_2, window_bounds = array<i64: 1, 64>}, {transform_indices = @transform_3, window_bounds = array<i64: 8, 128>}, {pipeline_mode = #tpu.pipeline_mode<synchronous>, transform_indices = @transform_4, window_bounds = array<i64: 64, 128>}, {pipeline_mode = #tpu.pipeline_mode<synchronous>, transform_indices = @transform_5, window_bounds = array<i64: 8, 128>}, {pipeline_mode = #tpu.pipeline_mode<synchronous>, transform_indices = @transform_6, window_bounds = array<i64: 8, 128>}]} {
    %c0_i32 = arith.constant 0 : i32
    %0 = arith.cmpi eq, %arg0, %c0_i32 : i32
    %1 = arith.extui %0 : i1 to i32
    %c0_i32_0 = arith.constant 0 : i32
    %2 = arith.cmpi ne, %1, %c0_i32_0 : i32
    scf.if %2 {
      %cst_15 = arith.constant 0.000000e+00 : f32
      %20 = vector.broadcast %cst_15 : f32 to vector<8x64xf32>
      %c0_16 = arith.constant 0 : index
      %c0_17 = arith.constant 0 : index
      %21 = vector.load %arg8[%c0_16, %c0_17] : memref<8x64xf32, #tpu.memory_space<vmem>>, vector<8x64xf32>
      tpu.vector_store %arg8[%c0_16, %c0_17], %20 {strides = array<i32>} : memref<8x64xf32, #tpu.memory_space<vmem>>, vector<8x64xf32>,
    } else {
    }
    %c0 = arith.constant 0 : index
    %c0_1 = arith.constant 0 : index
    %3 = vector.load %arg1[%c0, %c0_1] : memref<128x256xbf16, #tpu.memory_space<vmem>>, vector<128x256xbf16>
    %c0_2 = arith.constant 0 : index
    %c0_3 = arith.constant 0 : index
    %4 = vector.load %arg2[%c0_2, %c0_3] : memref<256x64xbf16, #tpu.memory_space<vmem>>, vector<256x64xbf16>
    %cst = arith.constant dense<0.000000e+00> : vector<128x64xf32>
    %5 = tpu.matmul %3, %4, %cst {dimension_numbers = #tpu.dot_dimension_numbers<[1], [0], [0], [1], [0, 0, 1, 1], [], []>} : vector<128x256xbf16>, vector<256x64xbf16>, vector<128x64xf32> -> vector<128x64xf32>
    %c0_4 = arith.constant 0 : index
    %c0_5 = arith.constant 0 : index
    %6 = vector.load %arg3[%c0_4, %c0_5] : memref<1x64xf32, #tpu.memory_space<vmem>>, vector<1x64xf32>
    %7 = vector.broadcast %6 : vector<1x64xf32> to vector<128x64xf32>
    %8 = arith.addf %5, %7 : vector<128x64xf32>
    %cst_6 = arith.constant 0.000000e+00 : f32
    %9 = vector.broadcast %cst_6 : f32 to vector<128x64xf32>
    %10 = arith.maximumf %8, %9 : vector<128x64xf32>
    %c0_7 = arith.constant 0 : index
    %c0_8 = arith.constant 0 : index
    %11 = vector.load %arg8[%c0_7, %c0_8] : memref<8x64xf32, #tpu.memory_space<vmem>>, vector<8x64xf32>
    %c0_9 = arith.constant 0 : index
    %c0_10 = arith.constant 0 : index
    %12 = vector.load %arg4[%c0_9, %c0_10] : memref<8x128xbf16, #tpu.memory_space<vmem>>, vector<8x128xbf16>
    %13 = arith.truncf %10 : vector<128x64xf32> to vector<128x64xbf16>
    %cst_11 = arith.constant dense<0.000000e+00> : vector<8x64xf32>
    %14 = tpu.matmul %12, %13, %cst_11 {dimension_numbers = #tpu.dot_dimension_numbers<[1], [0], [0], [1], [0, 0, 1, 1], [], []>} : vector<8x128xbf16>, vector<128x64xbf16>, vector<8x64xf32> -> vector<8x64xf32>
    %15 = arith.addf %11, %14 : vector<8x64xf32>
    %c0_12 = arith.constant 0 : index
    %c0_13 = arith.constant 0 : index
    %16 = vector.load %arg8[%c0_12, %c0_13] : memref<8x64xf32, #tpu.memory_space<vmem>>, vector<8x64xf32>
    tpu.vector_store %arg8[%c0_12, %c0_13], %15 {strides = array<i32>} : memref<8x64xf32, #tpu.memory_space<vmem>>, vector<8x64xf32>,
    %c1_i32 = arith.constant 1 : i32
    %17 = arith.cmpi eq, %arg0, %c1_i32 : i32
    %18 = arith.extui %17 : i1 to i32
    %c0_i32_14 = arith.constant 0 : i32
    %19 = arith.cmpi ne, %18, %c0_i32_14 : i32
    scf.if %19 {
      %c0_15 = arith.constant 0 : index
      %c0_16 = arith.constant 0 : index
      %20 = vector.load %arg8[%c0_15, %c0_16] : memref<8x64xf32, #tpu.memory_space<vmem>>, vector<8x64xf32>
      %21 = arith.truncf %20 : vector<8x64xf32> to vector<8x64xbf16>
      %c0_17 = arith.constant 0 : index
      %c0_18 = arith.constant 0 : index
      %22 = vector.load %arg5[%c0_17, %c0_18] : memref<64x128xbf16, #tpu.memory_space<vmem>>, vector<64x128xbf16>
      %cst_19 = arith.constant dense<0.000000e+00> : vector<8x128xf32>
      %23 = tpu.matmul %21, %22, %cst_19 {dimension_numbers = #tpu.dot_dimension_numbers<[1], [0], [0], [1], [0, 0, 1, 1], [], []>} : vector<8x64xbf16>, vector<64x128xbf16>, vector<8x128xf32> -> vector<8x128xf32>
      %c0_20 = arith.constant 0 : index
      %c0_21 = arith.constant 0 : index
      %24 = vector.load %arg6[%c0_20, %c0_21] : memref<8x128xf32, #tpu.memory_space<vmem>>, vector<8x128xf32>
      %25 = arith.addf %23, %24 : vector<8x128xf32>
      %c0_22 = arith.constant 0 : index
      %c0_23 = arith.constant 0 : index
      %26 = vector.load %arg7[%c0_22, %c0_23] : memref<8x128xf32, #tpu.memory_space<vmem>>, vector<8x128xf32>
      tpu.vector_store %arg7[%c0_22, %c0_23], %25 {strides = array<i32>} : memref<8x128xf32, #tpu.memory_space<vmem>>, vector<8x128xf32>,
    } else {
    }
    return
  }
  func.func @transform_0(%arg0: i32) -> (i32, i32) {
    %c0_i32 = arith.constant 0 : i32
    %c0_i32_0 = arith.constant 0 : i32
    return %arg0, %c0_i32 : i32, i32
  }
  func.func @transform_1(%arg0: i32) -> (i32, i32) {
    %c0_i32 = arith.constant 0 : i32
    %c0_i32_0 = arith.constant 0 : i32
    %c0_i32_1 = arith.constant 0 : i32
    return %c0_i32, %c0_i32_0 : i32, i32
  }
  func.func @transform_2(%arg0: i32) -> (i32, i32) {
    %c0_i32 = arith.constant 0 : i32
    %c0_i32_0 = arith.constant 0 : i32
    %c0_i32_1 = arith.constant 0 : i32
    return %c0_i32, %c0_i32_0 : i32, i32
  }
  func.func @transform_3(%arg0: i32) -> (i32, i32) {
    %c0_i32 = arith.constant 0 : i32
    %c0_i32_0 = arith.constant 0 : i32
    return %c0_i32, %arg0 : i32, i32
  }
  func.func @transform_4(%arg0: i32) -> (i32, i32) {
    %c0_i32 = arith.constant 0 : i32
    %c0_i32_0 = arith.constant 0 : i32
    %c0_i32_1 = arith.constant 0 : i32
    return %c0_i32, %c0_i32_0 : i32, i32
  }
  func.func @transform_5(%arg0: i32) -> (i32, i32) {
    %c0_i32 = arith.constant 0 : i32
    %c0_i32_0 = arith.constant 0 : i32
    %c0_i32_1 = arith.constant 0 : i32
    return %c0_i32, %c0_i32_0 : i32, i32
  }
  func.func @transform_6(%arg0: i32) -> (i32, i32) {
    %c0_i32 = arith.constant 0 : i32
    %c0_i32_0 = arith.constant 0 : i32
    %c0_i32_1 = arith.constant 0 : i32
    return %c0_i32, %c0_i32_0 : i32, i32
  }
}

</mosaic_0001>

<bundles_post_ra>
// kernel: tpu_custom_call.1
= control target key start
LH: loop header
LB: loop body
LE: loop exit
PB: predicated region body
PF: predicated region fallthrough
CT: control target
= control target key end

     0   :  { %11 = vsyncpa [#allocation4], 0  ;;  %s1485_s0 = inlined_call_operand.hbm [shape: bf16[256,256], index: 0, kind: input, shape index: {}]   ;;  %s1486_s1 = inlined_call_operand.vmem [shape: bf16[256,64], index: 1, kind: input, shape index: {}]   ;;  %s1487_s2 = inlined_call_operand.vmem [shape: f32[1,64], index: 2, kind: input, shape index: {}]   ;;  %s1488_s3 = inlined_call_operand.vmem [shape: bf16[8,256], index: 3, kind: input, shape index: {}]   ;;  %s1489_s4 = inlined_call_operand.vmem [shape: bf16[64,128], index: 4, kind: input, shape index: {}]   ;;  %s1490_s5 = inlined_call_operand.vmem [shape: f32[8,128], index: 5, kind: input, shape index: {}]   ;;  %s1491_s6 = inlined_call_operand.hbm [shape: f32[8,128], index: 6, kind: output, shape index: {}]  }
   0x1   :  { %13 = vsyncpa [#allocation4 + $0x1], 0 }
   0x2   :  { %14 = vsyncpa [#allocation5], 0  ;;  %s1236_s21 = smov 0   ;;  %s1238_s22 = smov 0  }
   0x3   :  { %s1240_s23 = smov 0   ;;  %s1242_s24 = smov 0  }
   0x4 LB: > { %s1255_s25 = sadd.s32 4294967295, %s1190_s24   ;;  %s1258_s26 = sadd.s32 1, %s1190_s24   ;;  %s1190_s24 = sphi %s1242_s24, %s1498_s24   ;;  %s1186_s23 = sphi %s1240_s23, %s1497_s23   ;;  %s1182_s22 = sphi %s1238_s22, %s1496_s22   ;;  %s1178_s21 = sphi %s1236_s21, %s1495_s21  }
   0x5   : > { %s24_s27 = ssub.s32 %s1190_s24, %s1258_s26  ;;  %s27_s28 = sadd.s32 1, %s1186_s23 }
   0x6   : > { %p25_p0 = scmp.eq.s32.totalorder %s24_s27, 0  ;;  %p34_p1 = scmp.ne.s32.totalorder %s1186_s23, %s1182_s22 }
   0x7   : > { %p35_p2 = scmp.eq.s32.totalorder %s1190_s24, 0  ;;  %p40_p3 = scmp.ne.s32.totalorder %s1182_s22, %s1178_s21 }
   0x8   : > { %s1268_s29 = scalar_select %p25_p0, %s1186_s23, %s27_s28  }
   0x9   : > { %p36_p4 = por %p35_p2, %p34_p1  ;;  %p41_p5 = scmp.eq.s32.totalorder %s1255_s25, 0 }
   0xa   : > { %p1009_p6 = scmp.lt.s32.totalorder %s1190_s24, 2  ;;  %s207_s7 = sand.u32 1, %s1186_s23  }
   0xb   : > { %p1272_p7 = por %p41_p5, %p40_p3  ;;  %s836_s8 = sshll.u32 %s207_s7, 7 }
   0xc   : > { %s888_s9 = sshll.u32 %s1190_s24, 11  ;;  %s211_s13 = scalar_lea.vmem [#allocation3], %s836_s8 }
   0xd   : > { %s1281_s12 = scalar_lea.hbm %s1485_s0, %s888_s9  ;;  %s219_s14 = sshll.u32 %s211_s13, 4  ;;  %s1283_s14 = int_to_ptr.vmem [resolvable:$true] %s219_s14 }
   0xe   : > { %p1285_p8 = pnand %p1009_p6, %p36_p4  ;;  %s1290_s16 = scalar_lea.sflag [#allocation4], %s207_s7 }
   0xf   : > { %s1096_s17 = scalar_lea.hbm %s1281_s12, 2048  ;;  %s1101_s20 = scalar_lea.hbm %s1485_s0, 4096 }
  0x10   : > { %p1097_p10 = scmp.ne.s32.totalorder %s1281_s12, %s1096_s17  ;;  %p1098_p11 = pneg %p1285_p8 }
  0x11   : > { %p1102_p0 = scmp.lt.u32.totalorder %s1281_s12, %s1485_s0  ;;  %p1103_p1 = scmp.lt.u32.totalorder %s1101_s20, %s1096_s17 }
  0x12   : > { %p1099_p12 = pnand %p1098_p11, %p1097_p10  ;;  %p1105_p3 = scmp.lt.u32.totalorder %s1096_s17, %s1281_s12 }
  0x13   : > { %p1104_p2 = por %p1103_p1, %p1102_p0 }
  0x14   : > { %p1100_p13 = pneg %p1099_p12 }
  0x15   : > { %p1106_p4 = por %p1105_p3, %p1104_p2 }
  0x17   : > { %p1107_p5 = pnand %p1106_p4, %p1100_p13 }
  0x19   : > { %1110 = shalt.err (!%p1107_p5)
}
  0x1a   : > { %s1111_s28 = scalar_lea.vmem %s1283_s14, 2048  ;;  %s1192_s7 = smov [#allocation3]  }
  0x1b   : > { %p1112_p6 = scmp.ne.s32.totalorder %s1283_s14, %s1111_s28  ;;  %s1116_s8 = sshll.u32 %s1192_s7, 4  ;;  %s1117_s8 = int_to_ptr.vmem [resolvable:$false] %s1116_s8 }
  0x1c   : > { %s1118_s9 = scalar_lea.vmem %s1117_s8, 4096  ;;  %p1119_p9 = scmp.lt.s32.totalorder %s1283_s14, %s1117_s8 }
  0x1d   : > { %p1114_p10 = pnand %p1112_p6, %p1098_p11  ;;  %p1120_p0 = scmp.lt.s32.totalorder %s1118_s9, %s1111_s28 }
  0x1f   : > { %p1115_p12 = pneg %p1114_p10  ;;  %p1121_p1 = por %p1120_p0, %p1119_p9 }
  0x21   : > { %p1122_p2 = pnand %p1121_p1, %p1115_p12 }
  0x23   : > { %1125 = shalt.err (!%p1122_p2)
}
  0x24   : > { %s1193_s10 = smov 128   ;;  %s1194_s11 = smov 8  }
  0x25   : > { %1008 = dma.hbm_to_vmem [thread:$0]  (!%p1285_p8), %s1281_s12, 2048, %s1283_s14, %s1290_s16, %s1193_s10, %s1193_s10, %s1194_s11  }
  0x26   : > { %p234_p11 = scmp.lt.s32.totalorder %s1190_s24, 3  ;;  %p1494_p13 = scmp.ge.s32.totalorder %s1190_s24, 1 }
  0x28   : > { %p235_p3 = pnand %p1494_p13, %p234_p11 }
  0x29   : > { %s240_s13 = sand.u32 (!%p235_p3), 1, %s1182_s22  }
  0x2a   : > { %238 = sbr.rel (%p235_p3) target bundleno = 839 (0x347), region = 44  ;;  %s841_s17 = sshll.u32 (!%p235_p3), %s240_s13, 7 }
  0x2b   : > { %s241_s18 = scalar_lea.sflag (!%p235_p3), [#allocation4], %s240_s13  ;;  %s1322_s19 = scalar_lea.vmem (!%p235_p3), [#allocation3], %s841_s17 }
  0x31   : > { %1169 = dma.done.wait (%p1272_p7), %s241_s18, 2048  }
  0x32   : > { %1171 = vsyncadd (%p1272_p7), %s241_s18, 4294965248  ;;  %p273_p9 = scmp.lt.s32.totalorder %s1255_s25, 1  ;;  %p843_p8 = scmp.ne.s32.totalorder %s1255_s25, 0 }
  0x33   : > { %vm282_vm0 = vcmask (!%p843_p8), 523264   ;;  %v1195_v0 = vmov (!%p843_p8), 0.0  }
  0x34   : > { %s274_s12 = scalar_select %p273_p9, %s1255_s25, 1 }
  0x35   : > { %281 = sbr.rel (%p843_p8) target bundleno = 60 (0x3c), region = 52  ;;  %283 = vst.msk [vmem:[#allocation2] sm:$0xff] (!%p843_p8), %vm282_vm0, %v1195_v0 }
  0x36   : > { %s842_s14 = sshll.u32 %s274_s12, 2 }
  0x37   : > { %s1333_s16 = scalar_lea.vmem %s1488_s3, %s842_s14 }
  0x3c PF: > { %v1052_v1 = vld [vmem:[%s1486_s1 + $0x40] sm:$0xff]   ;;  %v1054_v3 = vld [vmem:[%s1486_s1 + $0x48] sm:$0xff]   ;;  %v1056_v5 = vld [vmem:[%s1486_s1 + $0x50] sm:$0xff]   ;;  %v1196_v33 = vmov 0.0   ;;  %vm1197_vm1 = vmmov 0   ;;  %vm679_vm2 = vcmask 523264  }
  0x3d   : > { %v1053_v2 = vld [vmem:[%s1486_s1] sm:$0xff]   ;;  %889 = vmatprep.subr.bf16.mxu0 %v1052_v1  ;;  %v1055_v4 = vld [vmem:[%s1486_s1 + $0x8] sm:$0xff]   ;;  %v1057_v6 = vld [vmem:[%s1486_s1 + $0x10] sm:$0xff]   ;;  %967 = vmatprep.subr.bf16.mxu1 %v1196_v33  ;;  %p877_p7 = scmp.ne.s32.totalorder %s1255_s25, 1 }
  0x3e   : > { %890 = vmatpush3.bf16.msra.mxu0 %v1053_v2  ;;  %v1058_v7 = vld [vmem:[%s1486_s1 + $0x58] sm:$0xff]   ;;  %v1060_v9 = vld [vmem:[%s1486_s1 + $0x60] sm:$0xff]   ;;  %v1062_v11 = vld [vmem:[%s1486_s1 + $0x68] sm:$0xff]   ;;  %983 = vmatprep.mubr.msk.bf16.mxu1 %vm1197_vm1, %v1196_v33  ;;  %vm1199_vm3 = vmmov (!%p877_p7), 0  }
  0x3f   : > { %891 = vmatprep.subr.bf16.mxu0 %v1054_v3  ;;  %v1059_v8 = vld [vmem:[%s1486_s1 + $0x18] sm:$0xff]   ;;  %v1061_v10 = vld [vmem:[%s1486_s1 + $0x20] sm:$0xff]   ;;  %v1070_v12 = vld [vmem:[%s1322_s19 + $0x4] ss:$8 sps:$4 sm:$0xff]  }
  0x40   : > { %v1063_v13 = vld [vmem:[%s1486_s1 + $0x28] sm:$0xff]   ;;  %547 = vmatprep.mubr.bf16.mxu0 %v1070_v12  ;;  %v1064_v14 = vld [vmem:[%s1486_s1 + $0x70] sm:$0xff]   ;;  %v1066_v16 = vld [vmem:[%s1486_s1 + $0x78] sm:$0xff]  }
  0x41   : > { %v1065_v15 = vld [vmem:[%s1486_s1 + $0x30] sm:$0xff]   ;;  %v1067_v17 = vld [vmem:[%s1486_s1 + $0x38] sm:$0xff]   ;;  %v1405_v35 = vld [vmem:[%s1487_s2] ss:$0 sm:$0xff] }
  0x42   : > { %892 = vmatpush3.bf16.msra.mxu0 %v1055_v4  ;;  %v1068_v18 = vld [vmem:[%s1322_s19] ss:$8 sps:$4 sm:$0xff]   ;;  %v1071_v19 = vld [vmem:[%s1322_s19 + $0x14] ss:$8 sps:$4 sm:$0xff]   ;;  %v1073_v20 = vld [vmem:[%s1322_s19 + $0x10] ss:$8 sps:$4 sm:$0xff]  }
  0x43   : > { %893 = vmatprep.subr.bf16.mxu0 %v1056_v5  ;;  %v1074_v21 = vld [vmem:[%s1322_s19 + $0x24] ss:$8 sps:$4 sm:$0xff]   ;;  %v1076_v22 = vld [vmem:[%s1322_s19 + $0x20] ss:$8 sps:$4 sm:$0xff]   ;;  %v1077_v23 = vld [vmem:[%s1322_s19 + $0x34] ss:$8 sps:$4 sm:$0xff]  }
  0x44   : > { %v1079_v24 = vld [vmem:[%s1322_s19 + $0x30] ss:$8 sps:$4 sm:$0xff]   ;;  %v1080_v25 = vld [vmem:[%s1322_s19 + $0x44] ss:$8 sps:$4 sm:$0xff]   ;;  %v1082_v26 = vld [vmem:[%s1322_s19 + $0x40] ss:$8 sps:$4 sm:$0xff]  }
  0x45   : > { %v1083_v27 = vld [vmem:[%s1322_s19 + $0x54] ss:$8 sps:$4 sm:$0xff]   ;;  %v1085_v28 = vld [vmem:[%s1322_s19 + $0x50] ss:$8 sps:$4 sm:$0xff]   ;;  %v1086_v29 = vld [vmem:[%s1322_s19 + $0x64] ss:$8 sps:$4 sm:$0xff]  }
  0x46   : > { %894 = vmatpush3.bf16.msra.mxu0 %v1057_v6  ;;  %v1088_v30 = vld [vmem:[%s1322_s19 + $0x60] ss:$8 sps:$4 sm:$0xff]   ;;  %v1089_v31 = vld [vmem:[%s1322_s19 + $0x74] ss:$8 sps:$4 sm:$0xff]   ;;  %v1091_v32 = vld [vmem:[%s1322_s19 + $0x70] ss:$8 sps:$4 sm:$0xff]  }
  0x47   : > { %895 = vmatprep.subr.bf16.mxu0 %v1058_v7 }
  0x4a   : > { %896 = vmatpush3.bf16.msra.mxu0 %v1059_v8 }
  0x4b   : > { %897 = vmatprep.subr.bf16.mxu0 %v1060_v9 }
  0x4e   : > { %898 = vmatpush3.bf16.msra.mxu0 %v1061_v10 }
  0x4f   : > { %899 = vmatprep.subr.bf16.mxu0 %v1062_v11 }
  0x52   : > { %900 = vmatpush3.bf16.msra.mxu0 %v1063_v13 }
  0x53   : > { %901 = vmatprep.subr.bf16.mxu0 %v1064_v14 }
  0x56   : > { %902 = vmatpush3.bf16.msra.mxu0 %v1065_v15 }
  0x57   : > { %903 = vmatprep.subr.bf16.mxu0 %v1066_v16 }
  0x5a   : > { %904 = vmatpush3.bf16.msra.mxu0 %v1067_v17 }
  0x5d   : > { %548 = vmatmul.mubr.bf16.vlgmr.msra.gmra.mrb[0].mxu0 %v1068_v18 }
  0x5e   : > { %555 = vmatprep.mubr.bf16.mxu0 %v1071_v19 }
  0x65   : > { %556 = vmatmul.mubr.bf16.gmra.mrb[4].mxu0 %v1073_v20 }
  0x66   : > { %563 = vmatprep.mubr.bf16.mxu0 %v1074_v21 }
  0x6d   : > { %564 = vmatmul.mubr.bf16.gmra.mrb[8].mxu0 %v1076_v22 }
  0x6e   : > { %571 = vmatprep.mubr.bf16.mxu0 %v1077_v23 }
  0x75   : > { %572 = vmatmul.mubr.bf16.gmra.mrb[12].mxu0 %v1079_v24 }
  0x76   : > { %579 = vmatprep.mubr.bf16.mxu0 %v1080_v25 }
  0x7d   : > { %580 = vmatmul.mubr.bf16.gmra.mrb[16].mxu0 %v1082_v26 }
  0x7e   : > { %587 = vmatprep.mubr.bf16.mxu0 %v1083_v27 }
  0x85   : > { %588 = vmatmul.mubr.bf16.gmra.mrb[20].mxu0 %v1085_v28 }
  0x86   : > { %595 = vmatprep.mubr.bf16.mxu0 %v1086_v29 }
  0x8d   : > { %596 = vmatmul.mubr.bf16.gmra.mrb[24].mxu0 %v1088_v30 }
  0x8e   : > { %603 = vmatprep.mubr.bf16.mxu0 %v1089_v31 }
  0x95   : > { %604 = vmatmul.mubr.bf16.gmra.mrb[28].mxu0 %v1091_v32 }
 0x130   : > { %v905_v34 = vpop.f32.mrb[0].mxu0 }
 0x131   : > { %v906_v36 = vpop.f32.mrb[1].mxu0 }
 0x132   : > { %v907_v37 = vadd.f32 %v906_v36, %v905_v34  ;;  %v908_v38 = vpop.f32.mrb[2].mxu0 }
 0x133   : > { %v909_v39 = vpop.f32.mrb[3].mxu0 }
 0x134   : > { %v550_v40 = vadd.f32 %v907_v37, %v1405_v35  ;;  %v910_v41 = vadd.f32 %v909_v39, %v908_v38 }
 0x136   : > { %v553_v42 = vadd.f32 %v910_v41, %v1405_v35  ;;  %v612_v43 = vmax.f32 %v550_v40, 0.0 }
 0x138   : > { %v613_v44 = vmax.f32 %v553_v42, 0.0  ;;  %v911_v45 = vpop.f32.mrb[4].mxu0 }
 0x139   : > { %v912_v46 = vpop.f32.mrb[5].mxu0 }
 0x13a   : > { %v913_v47 = vadd.f32 %v912_v46, %v911_v45  ;;  %v914_v48 = vpop.f32.mrb[6].mxu0  ;;  %v630_v49 = vpack.c.bf16 %v613_v44, %v612_v43 }
 0x13b   : > { %v915_v50 = vpop.f32.mrb[7].mxu0 }
 0x13c   : > { %v558_v51 = vadd.f32 %v913_v47, %v1405_v35  ;;  %v916_v52 = vadd.f32 %v915_v50, %v914_v48  ;;  %968 = vmatpush3.bf16.msra.mxu1 %v630_v49 }
 0x13d   : > { %969 = vmatprep.subr.bf16.mxu1 %v1196_v33 }
 0x13e   : > { %v561_v53 = vadd.f32 %v916_v52, %v1405_v35  ;;  %v614_v54 = vmax.f32 %v558_v51, 0.0 }
 0x140   : > { %v615_v55 = vmax.f32 %v561_v53, 0.0  ;;  %v917_v56 = vpop.f32.mrb[8].mxu0 }
 0x141   : > { %v918_v57 = vpop.f32.mrb[9].mxu0 }
 0x142   : > { %v919_v58 = vadd.f32 %v918_v57, %v917_v56  ;;  %v920_v59 = vpop.f32.mrb[10].mxu0  ;;  %v631_v60 = vpack.c.bf16 %v615_v55, %v614_v54 }
 0x143   : > { %v921_v61 = vpop.f32.mrb[11].mxu0 }
 0x144   : > { %v566_v62 = vadd.f32 %v919_v58, %v1405_v35  ;;  %v922_v63 = vadd.f32 %v921_v61, %v920_v59  ;;  %970 = vmatpush3.bf16.msra.mxu1 %v631_v60  ;;  %v629_v61 = vld [vmem:[%s1333_s16] sm:$0xf] }
 0x145   : > { %971 = vmatprep.subr.bf16.mxu1 %v1196_v33 }
 0x146   : > { %v569_v0 = vadd.f32 %v922_v63, %v1405_v35  ;;  %v616_v1 = vmax.f32 %v566_v62, 0.0  ;;  %v628_v62 = vld [vmem:[#allocation2] sm:$0xff] }
 0x148   : > { %v617_v2 = vmax.f32 %v569_v0, 0.0  ;;  %v923_v3 = vpop.f32.mrb[12].mxu0 }
 0x149   : > { %v924_v4 = vpop.f32.mrb[13].mxu0 }
 0x14a   : > { %v925_v5 = vadd.f32 %v924_v4, %v923_v3  ;;  %v926_v6 = vpop.f32.mrb[14].mxu0  ;;  %v632_v7 = vpack.c.bf16 %v617_v2, %v616_v1  ;;  %v1093_v4 = vld [vmem:[%s1489_s4 + $0x8] sm:$0xff] (!%p877_p7)  }
 0x14b   : > { %v927_v8 = vpop.f32.mrb[15].mxu0 }
 0x14c   : > { %v574_v9 = vadd.f32 %v925_v5, %v1405_v35  ;;  %v928_v10 = vadd.f32 %v927_v8, %v926_v6  ;;  %972 = vmatpush3.bf16.msra.mxu1 %v632_v7  ;;  %v1094_v5 = vld [vmem:[%s1489_s4 + $0x10] sm:$0xff] (!%p877_p7)   ;;  %v1095_v6 = vld [vmem:[%s1489_s4 + $0x18] sm:$0xff] (!%p877_p7)  }
 0x14d   : > { %973 = vmatprep.subr.bf16.mxu1 %v1196_v33 }
 0x14e   : > { %v577_v11 = vadd.f32 %v928_v10, %v1405_v35  ;;  %v618_v12 = vmax.f32 %v574_v9, 0.0  ;;  %v695_v9 = vld [vmem:[%s1490_s5] sm:$0xff] (!%p877_p7) }
 0x150   : > { %v619_v13 = vmax.f32 %v577_v11, 0.0  ;;  %v929_v14 = vpop.f32.mrb[16].mxu0 }
 0x151   : > { %v930_v15 = vpop.f32.mrb[17].mxu0 }
 0x152   : > { %v931_v16 = vadd.f32 %v930_v15, %v929_v14  ;;  %v932_v17 = vpop.f32.mrb[18].mxu0  ;;  %v633_v18 = vpack.c.bf16 %v619_v13, %v618_v12 }
 0x153   : > { %v933_v19 = vpop.f32.mrb[19].mxu0 }
 0x154   : > { %v582_v20 = vadd.f32 %v931_v16, %v1405_v35  ;;  %v934_v21 = vadd.f32 %v933_v19, %v932_v17  ;;  %974 = vmatpush3.bf16.msra.mxu1 %v633_v18 }
 0x155   : > { %975 = vmatprep.subr.bf16.mxu1 %v1196_v33 }
 0x156   : > { %v585_v22 = vadd.f32 %v934_v21, %v1405_v35  ;;  %v620_v23 = vmax.f32 %v582_v20, 0.0 }
 0x158   : > { %v621_v24 = vmax.f32 %v585_v22, 0.0  ;;  %v935_v25 = vpop.f32.mrb[20].mxu0 }
 0x159   : > { %v936_v26 = vpop.f32.mrb[21].mxu0 }
 0x15a   : > { %v937_v27 = vadd.f32 %v936_v26, %v935_v25  ;;  %v938_v28 = vpop.f32.mrb[22].mxu0  ;;  %v634_v29 = vpack.c.bf16 %v621_v24, %v620_v23 }
 0x15b   : > { %v939_v30 = vpop.f32.mrb[23].mxu0 }
 0x15c   : > { %v590_v31 = vadd.f32 %v937_v27, %v1405_v35  ;;  %v940_v32 = vadd.f32 %v939_v30, %v938_v28  ;;  %976 = vmatpush3.bf16.msra.mxu1 %v634_v29 }
 0x15d   : > { %977 = vmatprep.subr.bf16.mxu1 %v1196_v33 }
 0x15e   : > { %v593_v34 = vadd.f32 %v940_v32, %v1405_v35  ;;  %v622_v36 = vmax.f32 %v590_v31, 0.0 }
 0x160   : > { %v623_v37 = vmax.f32 %v593_v34, 0.0  ;;  %v941_v38 = vpop.f32.mrb[24].mxu0 }
 0x161   : > { %v942_v39 = vpop.f32.mrb[25].mxu0 }
 0x162   : > { %v943_v40 = vadd.f32 %v942_v39, %v941_v38  ;;  %v944_v41 = vpop.f32.mrb[26].mxu0  ;;  %v635_v42 = vpack.c.bf16 %v623_v37, %v622_v36 }
 0x163   : > { %v945_v43 = vpop.f32.mrb[27].mxu0 }
 0x164   : > { %v598_v44 = vadd.f32 %v943_v40, %v1405_v35  ;;  %v946_v45 = vadd.f32 %v945_v43, %v944_v41  ;;  %978 = vmatpush3.bf16.msra.mxu1 %v635_v42 }
 0x165   : > { %979 = vmatprep.subr.bf16.mxu1 %v1196_v33 }
 0x166   : > { %v601_v46 = vadd.f32 %v946_v45, %v1405_v35  ;;  %v624_v47 = vmax.f32 %v598_v44, 0.0 }
 0x168   : > { %v625_v48 = vmax.f32 %v601_v46, 0.0  ;;  %v947_v49 = vpop.f32.mrb[28].mxu0 }
 0x169   : > { %v948_v50 = vpop.f32.mrb[29].mxu0 }
 0x16a   : > { %v949_v51 = vadd.f32 %v948_v50, %v947_v49  ;;  %v950_v52 = vpop.f32.mrb[30].mxu0  ;;  %v636_v53 = vpack.c.bf16 %v625_v48, %v624_v47 }
 0x16b   : > { %v951_v54 = vpop.f32.mrb[31].mxu0 }
 0x16c   : > { %v606_v55 = vadd.f32 %v949_v51, %v1405_v35  ;;  %v952_v56 = vadd.f32 %v951_v54, %v950_v52  ;;  %980 = vmatpush3.bf16.msra.mxu1 %v636_v53 }
 0x16d   : > { %981 = vmatprep.subr.bf16.mxu1 %v1196_v33  ;;  %v1092_v33 = vld [vmem:[%s1489_s4] sm:$0xff] (!%p877_p7)  }
 0x16e   : > { %v609_v57 = vadd.f32 %v952_v56, %v1405_v35  ;;  %v626_v58 = vmax.f32 %v606_v55, 0.0  ;;  %v1198_v35 = vmov (!%p877_p7), 0.0  }
 0x16f   : > { %987 = vmatprep.subr.bf16.mxu0 (!%p877_p7), %v1198_v35  ;;  %995 = vmatprep.mubr.msk.bf16.mxu0 (!%p877_p7), %vm1199_vm3, %v1198_v35 }
 0x170   : > { %v627_v59 = vmax.f32 %v609_v57, 0.0  ;;  %988 = vmatpush3.bf16.msra.mxu0 (!%p877_p7), %v1092_v33 }
 0x171   : > { %989 = vmatprep.subr.bf16.mxu0 (!%p877_p7), %v1198_v35 }
 0x172   : > { %v637_v60 = vpack.c.bf16 %v627_v59, %v626_v58 }
 0x174   : > { %982 = vmatpush3.bf16.msra.mxu1 %v637_v60  ;;  %990 = vmatpush3.bf16.msra.mxu0 (!%p877_p7), %v1093_v4 }
 0x175   : > { %991 = vmatprep.subr.bf16.mxu0 (!%p877_p7), %v1198_v35 }
 0x177   : > { %984 = vmatmul.mubr.bf16.vlgmr.msra.gmra.mrb[0].mxu1 %v629_v61 }
 0x178   : > { %992 = vmatpush3.bf16.msra.mxu0 (!%p877_p7), %v1094_v5 }
 0x179   : > { %993 = vmatprep.subr.bf16.mxu0 (!%p877_p7), %v1198_v35 }
 0x17c   : > { %994 = vmatpush3.bf16.msra.mxu0 (!%p877_p7), %v1095_v6 }
 0x247   : > { %684 = sbr.rel (%p877_p7) target bundleno = 814 (0x32e), region = 56 }
 0x24a   : > { %v672_v63 = vpop.f32.mrb[0].mxu1 }
 0x24b   : > { %v678_v0 = vadd.f32 %v672_v63, %v628_v62  ;;  %v985_v1 = vpop.f32.mrb[1].mxu1 }
 0x24c   : > { %v675_v2 = vpop.f32.mrb[2].mxu1 }
 0x24d   : > { %680 = vst.msk [vmem:[#allocation2] sm:$0xff] %vm679_vm2, %v678_v0  ;;  %v986_v3 = vpop.f32.mrb[3].mxu1 }
 0x254   : > { %v685_v7 = vld [vmem:[#allocation2] sm:$0xff] }
 0x255   : > { %v686_v8 = vpack.c.bf16 %v685_v7, %v685_v7 }
 0x257   : > { %996 = vmatmul.mubr.msk.bf16.vlgmr.msra.gmra.mrb[0].mxu0 %vm679_vm2, %v686_v8 }
 0x32a   : > { %v757_v10 = vpop.f32.mrb[0].mxu0 }
 0x32b   : > { %v758_v11 = vadd.f32 %v757_v10, %v695_v9  ;;  %v997_v12 = vpop.f32.mrb[1].mxu0 }
 0x32c   : > { %v760_v13 = vpop.f32.mrb[2].mxu0 }
 0x32d   : > { %763 = vst [vmem:[#allocation6] sm:$0xff] %v758_v11  ;;  %v998_v14 = vpop.f32.mrb[3].mxu0 }
 0x32e PF: > { %p1010_p4 = scmp.eq.s32.totalorder %s1255_s25, 1  ;;  %s1200_s10 = smov [#allocation6]  }
 0x32f   : > { %s771_s11 = sshll.u32 %s1200_s10, 4  ;;  %s772_s11 = int_to_ptr.vmem [resolvable:$true] %s771_s11 }
 0x330   : > { %s1126_s13 = scalar_lea.vmem %s772_s11, 128  ;;  %p1133_p12 = scmp.lt.s32.totalorder %s772_s11, %s772_s11 }
 0x331   : > { %p1127_p5 = scmp.ne.s32.totalorder %s772_s11, %s1126_s13  ;;  %p1134_p0 = scmp.lt.s32.totalorder %s1126_s13, %s1126_s13 }
 0x333   : > { %p1128_p6 = pnand %p1127_p5, %p1010_p4  ;;  %p1135_p1 = por %p1134_p0, %p1133_p12 }
 0x335   : > { %p1129_p10 = pneg %p1128_p6 }
 0x337   : > { %p1136_p2 = pnand %p1135_p1, %p1129_p10 }
 0x339   : > { %1139 = shalt.err (!%p1136_p2)
}
 0x33a   : > { %s1140_s12 = scalar_lea.hbm %s1491_s6, 128 }
 0x33b   : > { %p1141_p11 = scmp.ne.s32.totalorder %s1491_s6, %s1140_s12  ;;  %p1146_p9 = scmp.lt.u32.totalorder %s1140_s12, %s1491_s6 }
 0x33d   : > { %p1142_p13 = pnand %p1141_p11, %p1010_p4 }
 0x33f   : > { %p1143_p3 = pneg %p1142_p13 }
 0x341   : > { %p1148_p8 = pnand %p1146_p9, %p1143_p3 }
 0x343   : > { %1151 = shalt.err (!%p1148_p8)
}
 0x344   : > { %1002 = dma.vmem_to_hbm [thread:$0]  (%p1010_p4), %s772_s11, 128, %s1491_s6, [#allocation5]  }
 0x345   : > { %1173 = dma.done.wait (%p1010_p4), [#allocation5], 128  }
 0x346   : > { %1175 = vsyncadd (%p1010_p4), [#allocation5], 4294967168 }
 0x347 PF: > { %p17_p7 = scmp.ge.s32.totalorder %s1258_s26, 4   ;;  %s1495_s21 = smov %s1182_s22 }
 0x348   : > { %s1496_s22 = smov %s1186_s23  ;;  %s1497_s23 = smov %s1268_s29 }
 0x349   : > { %s1498_s24 = smov %s1258_s26  ;;  %19 = sbr.rel (!%p17_p7) target bundleno = 4 (0x4), region = 92 }
 0x350   :  { %784 = vsyncpa [#allocation4], 1 }
 0x351   :  { %786 = vsyncpa [#allocation4 + $0x1], 1 }
 0x352   :  { %787 = vsyncpa [#allocation5], 1 }
 0x353   :  { %789 = vsyncpa [#allocation5 + $0x1], 1 }

</bundles_post_ra>
